<compile_context>
chip_gen: v7x
topology: tpu7x:2x2x1
jax: 0.10.0
libtpu: 0.0.40
codegen_flags: <defaults>
</compile_context>

<pallas_src>
import math

import jax
import jax.numpy as jnp
from jax.experimental import pallas as pl
from jax.experimental.pallas import tpu as pltpu

_LANES = 128
_MAX_TILE_ROWS = 2048  # 2048 x 128 x f32 = 1 MiB per block


def _kspace_mul_kernel(q_ref, d_ref, o_ref):
    """phase_k = qsm_k * dipole_kernel on interleaved re/im f32 data."""
    o_ref[...] = q_ref[...] * d_ref[...]


def _choose_tile_rows(rows: int, b: int) -> int:
    """Row-tile size for a lane-dense (rows, 128) slab."""
    if rows <= _MAX_TILE_ROWS:
        t = rows  # full extent -> always a legal block shape
        if b == 1 and rows >= 16:
            # v7x has 2 TensorCores: make sure the parallel grid has >= 2 steps.
            t = (((rows + 1) // 2) + 7) // 8 * 8
        return t
    return _MAX_TILE_ROWS  # multiple of 8; ragged tail block is masked


@jax.jit
def forward_model(x: jnp.ndarray, dipole_kernel: jnp.ndarray) -> jnp.ndarray:
    """QSM forward model: real(ifft3(fft3(x) * dipole_kernel))."""
    spatial = x.shape[-3:]
    dd, hh, ww = spatial
    wf = ww // 2 + 1
    b = int(math.prod(x.shape[:-3]))

    xb = x.astype(jnp.float32).reshape((b,) + spatial)

    # --- glue: real 3-D FFT (no Pallas FFT primitive); half spectrum only ---
    qsm_k = jnp.fft.rfftn(xb, axes=(-3, -2, -1))            # (b, dd, hh, wf) c64

    m = dd * hh * wf
    n = 2 * m  # interleaved f32 elements per batch item

    # interleave re/im into one lane-dense f32 stream (single fused XLA pass)
    q_i = jnp.stack(
        [jnp.real(qsm_k), jnp.imag(qsm_k)], axis=-1).reshape(b, n)

    # --- dipole: slice to half spectrum, pre-interleave (repeat 2x per value) ---
    d = dipole_kernel.astype(jnp.float32)
    lead = d.shape[:-3] if d.shape[-3:] == spatial else ()
    if d.shape[-3:] == spatial and int(math.prod(lead)) <= 1:
        # shared dipole (optionally with size-1 leading broadcast dims)
        d_half = d.reshape(spatial)[..., :wf].reshape(m)
        d_i = jnp.repeat(d_half, 2)                          # (n,)
        dipole_batched = False
    else:
        # genuinely batched / broadcastable dipole -> per-batch planes
        d_full = jnp.broadcast_to(d, x.shape).reshape((b,) + spatial)
        d_half = d_full[..., :wf].reshape(b, m)
        d_i = jnp.repeat(d_half, 2, axis=-1)                 # (b, n)
        dipole_batched = True

    # --- lane-dense slab layout; pad only if n is not a multiple of 128 ---
    rows = (n + _LANES - 1) // _LANES
    pad = rows * _LANES - n
    if pad:
        q_i = jnp.pad(q_i, ((0, 0), (0, pad)))
        d_i = jnp.pad(d_i, ((0, 0),) * (d_i.ndim - 1) + ((0, pad),))
    q_s = q_i.reshape(b, rows, _LANES)
    d_s = d_i.reshape((b, rows, _LANES) if dipole_batched else (rows, _LANES))

    tile_rows = _choose_tile_rows(rows, b)
    n_row_tiles = pl.cdiv(rows, tile_rows)
    grid = (n_row_tiles, b)  # batch innermost -> shared dipole tile is reused

    q_spec = pl.BlockSpec((1, tile_rows, _LANES), lambda i, bb: (bb, i, 0))
    if dipole_batched:
        d_spec = pl.BlockSpec((1, tile_rows, _LANES), lambda i, bb: (bb, i, 0))
    else:
        d_spec = pl.BlockSpec((tile_rows, _LANES), lambda i, bb: (i, 0))

    out_s = pl.pallas_call(
        _kspace_mul_kernel,
        out_shape=jax.ShapeDtypeStruct((b, rows, _LANES), jnp.float32),
        grid_spec=pltpu.PrefetchScalarGridSpec(
            num_scalar_prefetch=0,
            grid=grid,
            in_specs=[q_spec, d_spec],
            out_specs=q_spec,
        ),
        input_output_aliases={0: 0},  # product overwrites the k-space slab
        compiler_params=pltpu.CompilerParams(
            dimension_semantics=("parallel", "parallel"),
            vmem_limit_bytes=32 * 1024 * 1024,
        ),
    )(q_s, d_s)

    out_flat = out_s.reshape(b, rows * _LANES)
    if pad:
        out_flat = out_flat[:, :n]
    out_pair = out_flat.reshape(b, dd, hh, wf, 2)
    phase_k = jax.lax.complex(out_pair[..., 0], out_pair[..., 1])

    # --- glue: inverse real 3-D FFT (output is already real) ---
    out = jnp.fft.irfftn(phase_k, s=spatial, axes=(-3, -2, -1))
    return out.reshape(x.shape).astype(jnp.float32)


def _make_dipole_kernel(spatial):
    """Standard QSM dipole kernel D(k) = 1/3 - kz^2 / |k|^2 (real, symmetric)."""
    dd, hh, ww = spatial
    kz = jnp.fft.fftfreq(dd)[:, None, None]
    ky = jnp.fft.fftfreq(hh)[None, :, None]
    kx = jnp.fft.fftfreq(ww)[None, None, :]
    k2 = kz ** 2 + ky ** 2 + kx ** 2
    dk = 1.0 / 3.0 - kz ** 2 / jnp.where(k2 == 0, 1.0, k2)
    return jnp.where(k2 == 0, 0.0, dk).astype(jnp.float32)


if __name__ == "__main__":
    key = jax.random.PRNGKey(0)
    B, D, H, W = 2, 8, 16, 16
    x = jax.random.normal(key, (B, D, H, W), dtype=jnp.float32)
    dipole_kernel = _make_dipole_kernel((D, H, W))  # shared (un-batched) dipole

    out = forward_model(x, dipole_kernel)
    out = jax.block_until_ready(out)

    # reference (full complex fftn/ifftn, matching the PyTorch module)
    ref = jnp.real(
        jnp.fft.ifftn(
            jnp.fft.fftn(x, axes=(-3, -2, -1)) * dipole_kernel,
            axes=(-3, -2, -1),
        )
    ).astype(jnp.float32)

    assert out.shape == x.shape and out.dtype == jnp.float32
    assert jnp.allclose(out, ref, atol=2e-3, rtol=2e-3)

    print("KERNEL_OK")
</pallas_src>

<mosaic_0001>
module attributes {stable_mosaic.version = 11 : i64} {
  func.func @_kspace_mul_kernel(%arg0: i32, %arg1: i32, %arg2: memref<1x18x128xf32, #tpu.memory_space<vmem>>, %arg3: memref<18x128xf32, #tpu.memory_space<vmem>>, %arg4: memref<1x18x128xf32, #tpu.memory_space<vmem>>) attributes {dimension_semantics = [#tpu.dimension_semantics<parallel>, #tpu.dimension_semantics<parallel>], iteration_bounds = array<i64: 1, 2>, scalar_prefetch = 0 : i64, scratch_operands = 0 : i64, tpu.core_type = #tpu.core_type<tc>, window_params = [{transform_indices = @transform_0, window_bounds = array<i64: 1, 18, 128>}, {transform_indices = @transform_1, window_bounds = array<i64: 18, 128>}, {transform_indices = @transform_2, window_bounds = array<i64: 1, 18, 128>}]} {
    %c0 = arith.constant 0 : index
    %c0_0 = arith.constant 0 : index
    %c0_1 = arith.constant 0 : index
    %0 = vector.load %arg2[%c0, %c0_0, %c0_1] : memref<1x18x128xf32, #tpu.memory_space<vmem>>, vector<1x18x128xf32>
    %c0_2 = arith.constant 0 : index
    %c0_3 = arith.constant 0 : index
    %1 = vector.load %arg3[%c0_2, %c0_3] : memref<18x128xf32, #tpu.memory_space<vmem>>, vector<18x128xf32>
    %2 = vector.shape_cast %1 : vector<18x128xf32> to vector<1x18x128xf32>
    %3 = arith.mulf %0, %2 : vector<1x18x128xf32>
    %c0_4 = arith.constant 0 : index
    %c0_5 = arith.constant 0 : index
    %c0_6 = arith.constant 0 : index
    %4 = vector.load %arg4[%c0_4, %c0_5, %c0_6] : memref<1x18x128xf32, #tpu.memory_space<vmem>>, vector<1x18x128xf32>
    tpu.vector_store %arg4[%c0_4, %c0_5, %c0_6], %3 {strides = array<i32>} : memref<1x18x128xf32, #tpu.memory_space<vmem>>, vector<1x18x128xf32>,
    return
  }
  func.func @transform_0(%arg0: i32, %arg1: i32) -> (i32, i32, i32) {
    %c0_i32 = arith.constant 0 : i32
    %c0_i32_0 = arith.constant 0 : i32
    return %arg1, %arg0, %c0_i32 : i32, i32, i32
  }
  func.func @transform_1(%arg0: i32, %arg1: i32) -> (i32, i32) {
    %c0_i32 = arith.constant 0 : i32
    %c0_i32_0 = arith.constant 0 : i32
    return %arg0, %c0_i32 : i32, i32
  }
  func.func @transform_2(%arg0: i32, %arg1: i32) -> (i32, i32, i32) {
    %c0_i32 = arith.constant 0 : i32
    %c0_i32_0 = arith.constant 0 : i32
    return %arg1, %arg0, %c0_i32 : i32, i32, i32
  }
}

</mosaic_0001>

<bundles_post_ra>
// kernel: forward_model.1
= control target key start
LH: loop header
LB: loop body
LE: loop exit
PB: predicated region body
PF: predicated region fallthrough
CT: control target
= control target key end

     0   :  { %s393_s9 = smov 0   ;;  %s395_s10 = smov 0   ;;  %s428_s0 = inlined_call_operand.vmem [shape: f32[2,18,128], index: 0, kind: input, shape index: {}, may-alias: {0,2}]   ;;  %s429_s1 = inlined_call_operand.vmem [shape: f32[18,128], index: 1, kind: input, shape index: {}]   ;;  %s430_s2 = inlined_call_operand.vmem [shape: f32[2,18,128], index: 2, kind: output, shape index: {}, may-alias: {0,2}]  }
   0x1   :  { %s397_s11 = smov 0  }
   0x2 LB: > { %s21_s12 = sadd.s32 1, %s372_s10  ;;  %p324_p0 = scmp.ge.s32.totalorder %s376_s11, 1  ;;  %s376_s11 = sphi %s397_s11, %s12_s11   ;;  %s372_s10 = sphi %s395_s10, %s432_s10   ;;  %s368_s9 = sphi %s393_s9, %s431_s9  }
   0x3   : > { %p22_p1 = scmp.ge.s32.totalorder %s21_s12, 2  ;;  %p144_p2 = scmp.lt.s32.totalorder %s376_s11, 3 }
   0x5   : > { %s434_s12 = smov (%p22_p1, %s21_s12), 0  ;;  %p145_p3 = pnand %p324_p0, %p144_p2 }
   0x6   : > { %p180_p4 = scmp.lt.s32.totalorder (!%p145_p3), %s368_s9, 1  ;;  %v208_v0 = vld [vmem:[%s429_s1] sm:$0xff] (!%p145_p3)  ;;  %v209_v1 = vld [vmem:[%s429_s1 + $0x8] sm:$0xff] (!%p145_p3)  ;;  %v210_v2 = vld [vmem:[%s429_s1 + $0x10] sm:$0x3] (!%p145_p3) }
   0x7   : > { %148 = sbr.rel (%p145_p3) target bundleno = 23 (0x17), region = 28 }
   0xe   : > { %s436_s9 = smov (!%p180_p4, %s368_s9), 1 }
   0xf   : > { %s329_s13 = smul.u32 24, %s436_s9 }
  0x11   : > { %s187_s22 = scalar_lea.vmem %s428_s0, %s329_s13  ;;  %s203_s25 = scalar_lea.vmem %s430_s2, %s329_s13 }
  0x12   : > { %v205_v3 = vld [vmem:[%s187_s22] sm:$0xff]  ;;  %v206_v4 = vld [vmem:[%s187_s22 + $0x8] sm:$0xff]  ;;  %v207_v5 = vld [vmem:[%s187_s22 + $0x10] sm:$0x3] }
  0x13   : > { %v211_v6 = vmul.f32 %v208_v0, %v205_v3  ;;  %v212_v7 = vmul.f32 %v209_v1, %v206_v4  ;;  %v213_v8 = vmul.f32 %v210_v2, %v207_v5 }
  0x15   : > { %214 = vst [vmem:[%s203_s25] sm:$0xff] %v211_v6  ;;  %215 = vst [vmem:[%s203_s25 + $0x8] sm:$0xff] %v212_v7 }
  0x16   : > { %216 = vst [vmem:[%s203_s25 + $0x10] sm:$0x3] %v213_v8 }
  0x17 PF: > { %s12_s11 = sadd.s32 1, %s376_s11   ;;  %s431_s9 = smov %s372_s10 }
  0x18   : > { %p9_p5 = scmp.ge.s32.totalorder %s12_s11, 4   ;;  %s432_s10 = smov %s434_s12 }
  0x1a   :  { %11 = sbr.rel (!%p9_p5) target bundleno = 2 (0x2), region = 61 }

// kernel: reverse.1
= control target key start
LH: loop header
LB: loop body
LE: loop exit
PB: predicated region body
PF: predicated region fallthrough
CT: control target
= control target key end

     0   :  { %v103_v3 = vlaneseq  ;;  %v96_v18 = vld [vmem:[#allocation0 + $0x7] ss:$-1 sm:$0xff]  ;;  %v110_v19 = vld [vmem:[#allocation0 + $0x17] ss:$-1 sm:$0xff]  ;;  %s604_s0 = inlined_call_operand.vmem [shape: f32[2,8,16,7], index: 0, kind: input, shape index: {}]   ;;  %s605_s1 = inlined_call_operand.vmem [shape: f32[2,8,16,7], index: 1, kind: output, shape index: {}]  }
   0x1   :  { %v60_v0 = vld [vmem:[%s604_s0] sm:$0xff]  ;;  %v62_v1 = vld [vmem:[%s604_s0 + $0x8] sm:$0xff]  ;;  %v64_v2 = vld [vmem:[%s604_s0 + $0x10] sm:$0xff]  ;;  %v97_v20 = vrot.slane %v96_v18, 1  ;;  %v111_v21 = vrot.slane %v110_v19, 1 }
   0x2   :  { %61 = vst [vmem:[#allocation0 + $0x8] sm:$0xff] %v60_v0  ;;  %63 = vst [vmem:[#allocation0 + $0x18] sm:$0xff] %v62_v1  ;;  %v66_v4 = vld [vmem:[%s604_s0 + $0x18] sm:$0xff]  ;;  %v68_v5 = vld [vmem:[%s604_s0 + $0x20] sm:$0xff]  ;;  %v500_v10 = vshrl.u32 %v103_v3, 7 }
   0x3   :  { %65 = vst [vmem:[#allocation0 + $0x28] sm:$0xff] %v64_v2  ;;  %v70_v6 = vld [vmem:[%s604_s0 + $0x28] sm:$0xff]  ;;  %67 = vst [vmem:[#allocation0 + $0x38] sm:$0xff] %v66_v4  ;;  %v72_v7 = vld [vmem:[%s604_s0 + $0x30] sm:$0xff] }
   0x4   :  { %69 = vst [vmem:[#allocation0 + $0x48] sm:$0xff] %v68_v5  ;;  %71 = vst [vmem:[#allocation0 + $0x58] sm:$0xff] %v70_v6  ;;  %v74_v8 = vld [vmem:[%s604_s0 + $0x38] sm:$0xff]  ;;  %v76_v9 = vld [vmem:[%s604_s0 + $0x40] sm:$0xff]  ;;  %vm105_vm0 = vcmp.lt.s32.totalorder %v500_v10, 7 }
   0x5   :  { %73 = vst [vmem:[#allocation0 + $0x68] sm:$0xff] %v72_v7  ;;  %75 = vst [vmem:[#allocation0 + $0x78] sm:$0xff] %v74_v8  ;;  %v78_v11 = vld [vmem:[%s604_s0 + $0x48] sm:$0xff]  ;;  %v80_v12 = vld [vmem:[%s604_s0 + $0x50] sm:$0xff] }
   0x6   :  { %77 = vst [vmem:[#allocation0 + $0x88] sm:$0xff] %v76_v9  ;;  %v82_v13 = vld [vmem:[%s604_s0 + $0x58] sm:$0xff]  ;;  %79 = vst [vmem:[#allocation0 + $0x98] sm:$0xff] %v78_v11  ;;  %v84_v14 = vld [vmem:[%s604_s0 + $0x60] sm:$0xff] }
   0x7   :  { %81 = vst [vmem:[#allocation0 + $0xa8] sm:$0xff] %v80_v12  ;;  %83 = vst [vmem:[#allocation0 + $0xb8] sm:$0xff] %v82_v13  ;;  %v86_v15 = vld [vmem:[%s604_s0 + $0x68] sm:$0xff]  ;;  %v88_v16 = vld [vmem:[%s604_s0 + $0x70] sm:$0xff] }
   0x8   :  { %85 = vst [vmem:[#allocation0 + $0xc8] sm:$0xff] %v84_v14  ;;  %87 = vst [vmem:[#allocation0 + $0xd8] sm:$0xff] %v86_v15  ;;  %v90_v17 = vld [vmem:[%s604_s0 + $0x78] sm:$0xff]  ;;  %v124_v22 = vld [vmem:[#allocation0 + $0x27] ss:$-1 sm:$0xff] }
   0x9   :  { %89 = vst [vmem:[#allocation0 + $0xe8] sm:$0xff] %v88_v16  ;;  %91 = vst [vmem:[#allocation0 + $0xf8] sm:$0xff] %v90_v17  ;;  %v138_v23 = vld [vmem:[#allocation0 + $0x37] ss:$-1 sm:$0xff]  ;;  %v125_v24 = vrot.slane %v124_v22, 1 }
   0xa   :  { %v139_v25 = vrot.slane %v138_v23, 1  ;;  %v152_v26 = vld [vmem:[#allocation0 + $0x47] ss:$-1 sm:$0xff]  ;;  %v166_v27 = vld [vmem:[#allocation0 + $0x57] ss:$-1 sm:$0xff]  ;;  %98 = vst [vmem:[#allocation1] sm:$0xff] %v97_v20 }
   0xb   :  { %v101_v28 = vld [vmem:[#allocation0 + $0xf] ss:$-1 sm:$0xff]  ;;  %112 = vst [vmem:[#allocation1 + $0x8] sm:$0xff] %v111_v21  ;;  %v115_v29 = vld [vmem:[#allocation0 + $0x1f] ss:$-1 sm:$0xff]  ;;  %126 = vst [vmem:[#allocation1 + $0x10] sm:$0xff] %v125_v24 }
   0xc   :  { %v129_v30 = vld [vmem:[#allocation0 + $0x2f] ss:$-1 sm:$0xff]  ;;  %v102_v31 = vrot.slane %v101_v28, 1  ;;  %v116_v32 = vrot.slane %v115_v29, 1  ;;  %140 = vst [vmem:[#allocation1 + $0x18] sm:$0xff] %v139_v25  ;;  %v153_v35 = vrot.slane %v152_v26, 1 }
   0xd   :  { %v130_v33 = vrot.slane %v129_v30, 1  ;;  %v143_v34 = vld [vmem:[#allocation0 + $0x3f] ss:$-1 sm:$0xff]  ;;  %v157_v37 = vld [vmem:[#allocation0 + $0x4f] ss:$-1 sm:$0xff]  ;;  %v167_v38 = vrot.slane %v166_v27, 1 }
   0xe   :  { %v144_v36 = vrot.slane %v143_v34, 1  ;;  %v171_v39 = vld [vmem:[#allocation0 + $0x5f] ss:$-1 sm:$0xff]  ;;  %106 = vst.msk [vmem:[#allocation1] sm:$0xff] %vm105_vm0, %v102_v31  ;;  %120 = vst.msk [vmem:[#allocation1 + $0x8] sm:$0xff] %vm105_vm0, %v116_v32  ;;  %v158_v40 = vrot.slane %v157_v37, 1 }
   0xf   :  { %134 = vst.msk [vmem:[#allocation1 + $0x10] sm:$0xff] %vm105_vm0, %v130_v33  ;;  %154 = vst [vmem:[#allocation1 + $0x20] sm:$0xff] %v153_v35  ;;  %v172_v41 = vrot.slane %v171_v39, 1  ;;  %v180_v42 = vld [vmem:[#allocation0 + $0x67] ss:$-1 sm:$0xff] }
  0x10   :  { %v185_v43 = vld [vmem:[#allocation0 + $0x6f] ss:$-1 sm:$0xff]  ;;  %148 = vst.msk [vmem:[#allocation1 + $0x18] sm:$0xff] %vm105_vm0, %v144_v36  ;;  %168 = vst [vmem:[#allocation1 + $0x28] sm:$0xff] %v167_v38  ;;  %v181_v44 = vrot.slane %v180_v42, 1 }
  0x11   :  { %v186_v45 = vrot.slane %v185_v43, 1  ;;  %v194_v46 = vld [vmem:[#allocation0 + $0x77] ss:$-1 sm:$0xff]  ;;  %v199_v47 = vld [vmem:[#allocation0 + $0x7f] ss:$-1 sm:$0xff]  ;;  %162 = vst.msk [vmem:[#allocation1 + $0x20] sm:$0xff] %vm105_vm0, %v158_v40 }
  0x12   :  { %176 = vst.msk [vmem:[#allocation1 + $0x28] sm:$0xff] %vm105_vm0, %v172_v41  ;;  %v195_v48 = vrot.slane %v194_v46, 1  ;;  %v200_v49 = vrot.slane %v199_v47, 1  ;;  %v208_v50 = vld [vmem:[#allocation0 + $0x87] ss:$-1 sm:$0xff]  ;;  %182 = vst [vmem:[#allocation1 + $0x30] sm:$0xff] %v181_v44 }
  0x13   :  { %v213_v51 = vld [vmem:[#allocation0 + $0x8f] ss:$-1 sm:$0xff]  ;;  %v209_v52 = vrot.slane %v208_v50, 1  ;;  %v222_v54 = vld [vmem:[#allocation0 + $0x97] ss:$-1 sm:$0xff]  ;;  %190 = vst.msk [vmem:[#allocation1 + $0x30] sm:$0xff] %vm105_vm0, %v186_v45 }
  0x14   :  { %v214_v53 = vrot.slane %v213_v51, 1  ;;  %v227_v55 = vld [vmem:[#allocation0 + $0x9f] ss:$-1 sm:$0xff]  ;;  %196 = vst [vmem:[#allocation1 + $0x38] sm:$0xff] %v195_v48  ;;  %v223_v56 = vrot.slane %v222_v54, 1 }
  0x15   :  { %v228_v57 = vrot.slane %v227_v55, 1  ;;  %v236_v58 = vld [vmem:[#allocation0 + $0xa7] ss:$-1 sm:$0xff]  ;;  %v241_v59 = vld [vmem:[#allocation0 + $0xaf] ss:$-1 sm:$0xff]  ;;  %204 = vst.msk [vmem:[#allocation1 + $0x38] sm:$0xff] %vm105_vm0, %v200_v49 }
  0x16   :  { %210 = vst [vmem:[#allocation1 + $0x40] sm:$0xff] %v209_v52  ;;  %v237_v60 = vrot.slane %v236_v58, 1  ;;  %v242_v61 = vrot.slane %v241_v59, 1  ;;  %v250_v62 = vld [vmem:[#allocation0 + $0xb7] ss:$-1 sm:$0xff]  ;;  %224 = vst [vmem:[#allocation1 + $0x48] sm:$0xff] %v223_v56 }
  0x17   :  { %v255_v63 = vld [vmem:[#allocation0 + $0xbf] ss:$-1 sm:$0xff]  ;;  %218 = vst.msk [vmem:[#allocation1 + $0x40] sm:$0xff] %vm105_vm0, %v214_v53  ;;  %v251_v0 = vrot.slane %v250_v62, 1  ;;  %v264_v2 = vld [vmem:[#allocation0 + $0xc7] ss:$-1 sm:$0xff] }
  0x18   :  { %v256_v1 = vrot.slane %v255_v63, 1  ;;  %v269_v3 = vld [vmem:[#allocation0 + $0xcf] ss:$-1 sm:$0xff]  ;;  %232 = vst.msk [vmem:[#allocation1 + $0x48] sm:$0xff] %vm105_vm0, %v228_v57  ;;  %238 = vst [vmem:[#allocation1 + $0x50] sm:$0xff] %v237_v60  ;;  %v265_v4 = vrot.slane %v264_v2, 1 }
  0x19   :  { %v270_v5 = vrot.slane %v269_v3, 1  ;;  %v278_v6 = vld [vmem:[#allocation0 + $0xd7] ss:$-1 sm:$0xff]  ;;  %v283_v7 = vld [vmem:[#allocation0 + $0xdf] ss:$-1 sm:$0xff]  ;;  %246 = vst.msk [vmem:[#allocation1 + $0x50] sm:$0xff] %vm105_vm0, %v242_v61 }
  0x1a   :  { %252 = vst [vmem:[#allocation1 + $0x58] sm:$0xff] %v251_v0  ;;  %v279_v8 = vrot.slane %v278_v6, 1  ;;  %v284_v9 = vrot.slane %v283_v7, 1  ;;  %v292_v11 = vld [vmem:[#allocation0 + $0xe7] ss:$-1 sm:$0xff]  ;;  %266 = vst [vmem:[#allocation1 + $0x60] sm:$0xff] %v265_v4 }
  0x1b   :  { %v297_v12 = vld [vmem:[#allocation0 + $0xef] ss:$-1 sm:$0xff]  ;;  %260 = vst.msk [vmem:[#allocation1 + $0x58] sm:$0xff] %vm105_vm0, %v256_v1  ;;  %v293_v13 = vrot.slane %v292_v11, 1  ;;  %v306_v15 = vld [vmem:[#allocation0 + $0xf7] ss:$-1 sm:$0xff] }
  0x1c   :  { %v298_v14 = vrot.slane %v297_v12, 1  ;;  %v311_v16 = vld [vmem:[#allocation0 + $0xff] ss:$-1 sm:$0xff]  ;;  %274 = vst.msk [vmem:[#allocation1 + $0x60] sm:$0xff] %vm105_vm0, %v270_v5  ;;  %280 = vst [vmem:[#allocation1 + $0x68] sm:$0xff] %v279_v8  ;;  %v307_v17 = vrot.slane %v306_v15, 1 }
  0x1d   :  { %v312_v18 = vrot.slane %v311_v16, 1  ;;  %v374_v19 = vld [vmem:[#allocation1] sm:$0xff]  ;;  %v376_v20 = vld [vmem:[#allocation1 + $0x8] sm:$0xff]  ;;  %v378_v21 = vld [vmem:[#allocation1 + $0x10] sm:$0xff]  ;;  %288 = vst.msk [vmem:[#allocation1 + $0x68] sm:$0xff] %vm105_vm0, %v284_v9 }
  0x1e   :  { %294 = vst [vmem:[#allocation1 + $0x70] sm:$0xff] %v293_v13  ;;  %375 = vst [vmem:[%s605_s1] sm:$0xff] %v374_v19  ;;  %v380_v22 = vld [vmem:[#allocation1 + $0x18] sm:$0xff]  ;;  %v382_v23 = vld [vmem:[#allocation1 + $0x20] sm:$0xff] }
  0x1f   :  { %377 = vst [vmem:[%s605_s1 + $0x8] sm:$0xff] %v376_v20  ;;  %379 = vst [vmem:[%s605_s1 + $0x10] sm:$0xff] %v378_v21  ;;  %v384_v24 = vld [vmem:[#allocation1 + $0x28] sm:$0xff]  ;;  %v386_v25 = vld [vmem:[#allocation1 + $0x30] sm:$0xff] }
  0x20   :  { %302 = vst.msk [vmem:[#allocation1 + $0x70] sm:$0xff] %vm105_vm0, %v298_v14  ;;  %308 = vst [vmem:[#allocation1 + $0x78] sm:$0xff] %v307_v17  ;;  %v388_v26 = vld [vmem:[#allocation1 + $0x38] sm:$0xff]  ;;  %v390_v10 = vld [vmem:[#allocation1 + $0x40] sm:$0xff] }
  0x21   :  { %381 = vst [vmem:[%s605_s1 + $0x18] sm:$0xff] %v380_v22  ;;  %383 = vst [vmem:[%s605_s1 + $0x20] sm:$0xff] %v382_v23  ;;  %v392_v27 = vld [vmem:[#allocation1 + $0x48] sm:$0xff]  ;;  %v394_v28 = vld [vmem:[#allocation1 + $0x50] sm:$0xff] }
  0x22   :  { %385 = vst [vmem:[%s605_s1 + $0x28] sm:$0xff] %v384_v24  ;;  %316 = vst.msk [vmem:[#allocation1 + $0x78] sm:$0xff] %vm105_vm0, %v312_v18  ;;  %v396_v29 = vld [vmem:[#allocation1 + $0x58] sm:$0xff] }
  0x23   :  { %387 = vst [vmem:[%s605_s1 + $0x30] sm:$0xff] %v386_v25  ;;  %389 = vst [vmem:[%s605_s1 + $0x38] sm:$0xff] %v388_v26  ;;  %v398_v30 = vld [vmem:[#allocation1 + $0x60] sm:$0xff] }
  0x24   :  { %391 = vst [vmem:[%s605_s1 + $0x40] sm:$0xff] %v390_v10  ;;  %393 = vst [vmem:[%s605_s1 + $0x48] sm:$0xff] %v392_v27  ;;  %v400_v31 = vld [vmem:[#allocation1 + $0x68] sm:$0xff] }
  0x25   :  { %395 = vst [vmem:[%s605_s1 + $0x50] sm:$0xff] %v394_v28  ;;  %397 = vst [vmem:[%s605_s1 + $0x58] sm:$0xff] %v396_v29 }
  0x26   :  { %399 = vst [vmem:[%s605_s1 + $0x60] sm:$0xff] %v398_v30  ;;  %401 = vst [vmem:[%s605_s1 + $0x68] sm:$0xff] %v400_v31 }
  0x27   :  { %v402_v32 = vld [vmem:[#allocation1 + $0x70] sm:$0xff] }
  0x28   :  { %403 = vst [vmem:[%s605_s1 + $0x70] sm:$0xff] %v402_v32 }
  0x29   :  { %v404_v33 = vld [vmem:[#allocation1 + $0x78] sm:$0xff] }
  0x2a   :  { %405 = vst [vmem:[%s605_s1 + $0x78] sm:$0xff] %v404_v33 }

</bundles_post_ra>
